<compile_context>
chip_gen: v7x
topology: tpu7x:2x2x1
jax: 0.10.0
libtpu: 0.0.40
codegen_flags: <defaults>
</compile_context>

<pallas_src>
import functools

import jax
import jax.numpy as jnp
from jax.experimental import pallas as pl
from jax.experimental.pallas import tpu as pltpu


def _rmsnorm_layernorm_kernel(x_ref, w_ref, b_ref, o_ref, *, eps_rms, eps_ln):
    # Block is (row_tile, hidden) with hidden the true (unpadded) size, so the
    # lane reductions below are exact with no masking needed.
    x = x_ref[...].astype(jnp.float32)
    hidden = x.shape[-1]

    inv_h = jnp.float32(1.0 / hidden)
    s1 = jnp.sum(x, axis=-1, keepdims=True)          # sum(x)
    s2 = jnp.sum(x * x, axis=-1, keepdims=True)      # sum(x^2)

    mean = s1 * inv_h                                # E[x]
    msq = s2 * inv_h                                 # E[x^2]
    rms = jnp.sqrt(msq)
    var = jnp.maximum(msq - mean * mean, 0.0)        # biased var of x

    # Fused RMS-scale + LayerNorm:
    #   LayerNorm(x / (rms+eps_rms)) == (x - mean) * rsqrt(var + eps_ln*(rms+eps_rms)^2)
    r = rms + eps_rms
    scale = jax.lax.rsqrt(var + eps_ln * r * r)      # (row_tile, 1)

    # Single fused affine expression; downcast folded into the store so no extra
    # full-tile f32 temporary stays live.
    o_ref[...] = (
        (x - mean) * scale * w_ref[...].astype(jnp.float32)
        + b_ref[...].astype(jnp.float32)
    ).astype(o_ref.dtype)


def _round_up(a, b):
    return ((a + b - 1) // b) * b


def rmsnorm(x, weight, bias, *, row_tile=None, eps_rms=1e-5, eps_ln=1e-5):
    """x: (..., hidden); weight/bias: (hidden,). Returns same shape/dtype as x."""
    orig_shape = x.shape
    hidden = orig_shape[-1]
    rows = 1
    for d in orig_shape[:-1]:
        rows *= d

    itemsize = jnp.dtype(x.dtype).itemsize
    sublane = 8 if itemsize >= 4 else (16 if itemsize == 2 else 32)
    # The in-VMEM layout pads the lane axis to 128; size tiles against that
    # padded width (HBM traffic still only moves the true `hidden` lanes).
    lane_p = _round_up(hidden, 128)

    if row_tile is None:
        # ~4 MiB (f32-equivalent) per block: 2x double-buffered input + 2x output
        # + in-kernel f32 temporaries stay well under the explicit 48 MiB VMEM
        # limit on every generation while amortizing per-grid-step overhead.
        target_bytes = 4 * 1024 * 1024
        row_tile = max(sublane, target_bytes // (lane_p * 4))
        # Keep >= ~8 grid steps on large inputs so both v7x TensorCores and the
        # DMA pipeline stay busy, but never shrink below 256 rows.
        row_tile = min(row_tile, max(256, pl.cdiv(rows, 8)))
    row_tile = max(sublane, (row_tile // sublane) * sublane)
    # Don't make the tile bigger than the whole (sublane-rounded) problem.
    row_tile = min(row_tile, _round_up(rows, sublane))

    grid = (pl.cdiv(rows, row_tile),)

    # Pure reshapes only — no pads, no output slice.
    x2d = x.reshape(rows, hidden)
    w2d = weight.reshape(1, hidden)
    b2d = bias.reshape(1, hidden)

    kernel = functools.partial(
        _rmsnorm_layernorm_kernel, eps_rms=eps_rms, eps_ln=eps_ln
    )

    out2d = pl.pallas_call(
        kernel,
        out_shape=jax.ShapeDtypeStruct((rows, hidden), x.dtype),
        grid_spec=pltpu.PrefetchScalarGridSpec(
            num_scalar_prefetch=0,
            grid=grid,
            in_specs=[
                pl.BlockSpec((row_tile, hidden), lambda i: (i, 0)),
                # weight/bias stay VMEM-resident (same block every step).
                pl.BlockSpec((1, hidden), lambda i: (0, 0)),
                pl.BlockSpec((1, hidden), lambda i: (0, 0)),
            ],
            out_specs=pl.BlockSpec((row_tile, hidden), lambda i: (i, 0)),
        ),
        compiler_params=pltpu.CompilerParams(
            dimension_semantics=("parallel",),
            vmem_limit_bytes=48 * 1024 * 1024,
        ),
    )(x2d, w2d, b2d)

    return out2d.reshape(orig_shape)


if __name__ == "__main__":
    batch, seq, hidden = 2, 8, 32

    key = jax.random.PRNGKey(0)
    x = jax.random.normal(key, (batch, seq, hidden), dtype=jnp.float32)

    # nn.LayerNorm default init: weight = ones, bias = zeros (deterministic).
    weight = jnp.ones((hidden,), dtype=jnp.float32)
    bias = jnp.zeros((hidden,), dtype=jnp.float32)

    out = rmsnorm(x, weight, bias)
    jax.block_until_ready(out)

    # Pure-JAX reference (direct, un-fused formulation — matches the PyTorch module).
    rms = jnp.sqrt(jnp.mean(x * x, axis=-1, keepdims=True))
    xr = x / (rms + 1e-5)
    mu = jnp.mean(xr, axis=-1, keepdims=True)
    var = jnp.mean((xr - mu) ** 2, axis=-1, keepdims=True)
    ref = (xr - mu) / jnp.sqrt(var + 1e-5) * weight + bias
    assert jnp.allclose(out, ref, atol=1e-4, rtol=1e-4), "mismatch vs reference"

    print("KERNEL_OK")
</pallas_src>

<mosaic_0001>
module attributes {stable_mosaic.version = 11 : i64} {
  func.func @_rmsnorm_layernorm_kernel(%arg0: i32, %arg1: memref<16x32xf32, #tpu.memory_space<vmem>>, %arg2: memref<1x32xf32, #tpu.memory_space<vmem>>, %arg3: memref<1x32xf32, #tpu.memory_space<vmem>>, %arg4: memref<16x32xf32, #tpu.memory_space<vmem>>) attributes {dimension_semantics = [#tpu.dimension_semantics<parallel>], iteration_bounds = array<i64: 1>, scalar_prefetch = 0 : i64, scratch_operands = 0 : i64, tpu.core_type = #tpu.core_type<tc>, window_params = [{transform_indices = @transform_0, window_bounds = array<i64: 16, 32>}, {pipeline_mode = #tpu.pipeline_mode<synchronous>, transform_indices = @transform_1, window_bounds = array<i64: 1, 32>}, {pipeline_mode = #tpu.pipeline_mode<synchronous>, transform_indices = @transform_2, window_bounds = array<i64: 1, 32>}, {transform_indices = @transform_3, window_bounds = array<i64: 16, 32>}]} {
    %c0 = arith.constant 0 : index
    %c0_0 = arith.constant 0 : index
    %0 = vector.load %arg1[%c0, %c0_0] : memref<16x32xf32, #tpu.memory_space<vmem>>, vector<16x32xf32>
    %cst = arith.constant dense<0.000000e+00> : vector<16xf32>
    %1 = vector.multi_reduction <add>, %0, %cst [1] : vector<16x32xf32> to vector<16xf32>
    %2 = vector.shape_cast %1 : vector<16xf32> to vector<16x1xf32>
    %3 = arith.mulf %0, %0 : vector<16x32xf32>
    %cst_1 = arith.constant dense<0.000000e+00> : vector<16xf32>
    %4 = vector.multi_reduction <add>, %3, %cst_1 [1] : vector<16x32xf32> to vector<16xf32>
    %5 = vector.shape_cast %4 : vector<16xf32> to vector<16x1xf32>
    %cst_2 = arith.constant 3.125000e-02 : f32
    %6 = vector.broadcast %cst_2 : f32 to vector<16x1xf32>
    %7 = arith.mulf %2, %6 : vector<16x1xf32>
    %cst_3 = arith.constant 3.125000e-02 : f32
    %8 = vector.broadcast %cst_3 : f32 to vector<16x1xf32>
    %9 = arith.mulf %5, %8 : vector<16x1xf32>
    %10 = math.sqrt %9 : vector<16x1xf32>
    %11 = arith.mulf %7, %7 : vector<16x1xf32>
    %12 = arith.subf %9, %11 : vector<16x1xf32>
    %cst_4 = arith.constant 0.000000e+00 : f32
    %13 = vector.broadcast %cst_4 : f32 to vector<16x1xf32>
    %14 = arith.maximumf %12, %13 : vector<16x1xf32>
    %cst_5 = arith.constant 9.99999974E-6 : f32
    %15 = vector.broadcast %cst_5 : f32 to vector<16x1xf32>
    %16 = arith.addf %10, %15 : vector<16x1xf32>
    %cst_6 = arith.constant 9.99999974E-6 : f32
    %17 = vector.broadcast %cst_6 : f32 to vector<16x1xf32>
    %18 = arith.mulf %17, %16 : vector<16x1xf32>
    %19 = arith.mulf %18, %16 : vector<16x1xf32>
    %20 = arith.addf %14, %19 : vector<16x1xf32>
    %21 = math.rsqrt %20 : vector<16x1xf32>
    %22 = vector.broadcast %7 : vector<16x1xf32> to vector<16x32xf32>
    %23 = arith.subf %0, %22 : vector<16x32xf32>
    %24 = vector.broadcast %21 : vector<16x1xf32> to vector<16x32xf32>
    %25 = arith.mulf %23, %24 : vector<16x32xf32>
    %c0_7 = arith.constant 0 : index
    %c0_8 = arith.constant 0 : index
    %26 = vector.load %arg2[%c0_7, %c0_8] : memref<1x32xf32, #tpu.memory_space<vmem>>, vector<1x32xf32>
    %27 = vector.broadcast %26 : vector<1x32xf32> to vector<16x32xf32>
    %28 = arith.mulf %25, %27 : vector<16x32xf32>
    %c0_9 = arith.constant 0 : index
    %c0_10 = arith.constant 0 : index
    %29 = vector.load %arg3[%c0_9, %c0_10] : memref<1x32xf32, #tpu.memory_space<vmem>>, vector<1x32xf32>
    %30 = vector.broadcast %29 : vector<1x32xf32> to vector<16x32xf32>
    %31 = arith.addf %28, %30 : vector<16x32xf32>
    %c0_11 = arith.constant 0 : index
    %c0_12 = arith.constant 0 : index
    %32 = vector.load %arg4[%c0_11, %c0_12] : memref<16x32xf32, #tpu.memory_space<vmem>>, vector<16x32xf32>
    tpu.vector_store %arg4[%c0_11, %c0_12], %31 {strides = array<i32>} : memref<16x32xf32, #tpu.memory_space<vmem>>, vector<16x32xf32>,
    return
  }
  func.func @transform_0(%arg0: i32) -> (i32, i32) {
    %c0_i32 = arith.constant 0 : i32
    %c0_i32_0 = arith.constant 0 : i32
    return %arg0, %c0_i32 : i32, i32
  }
  func.func @transform_1(%arg0: i32) -> (i32, i32) {
    %c0_i32 = arith.constant 0 : i32
    %c0_i32_0 = arith.constant 0 : i32
    %c0_i32_1 = arith.constant 0 : i32
    return %c0_i32, %c0_i32_0 : i32, i32
  }
  func.func @transform_2(%arg0: i32) -> (i32, i32) {
    %c0_i32 = arith.constant 0 : i32
    %c0_i32_0 = arith.constant 0 : i32
    %c0_i32_1 = arith.constant 0 : i32
    return %c0_i32, %c0_i32_0 : i32, i32
  }
  func.func @transform_3(%arg0: i32) -> (i32, i32) {
    %c0_i32 = arith.constant 0 : i32
    %c0_i32_0 = arith.constant 0 : i32
    return %arg0, %c0_i32 : i32, i32
  }
}

</mosaic_0001>

<bundles_post_ra>
// kernel: tpu_custom_call.1
= control target key start
LH: loop header
LB: loop body
LE: loop exit
PB: predicated region body
PF: predicated region fallthrough
CT: control target
= control target key end

     0   :  { %8 = vsyncpa [#allocation3], 0  ;;  %s249_s0 = inlined_call_operand.hbm [shape: f32[16,32], index: 0, kind: input, shape index: {}]   ;;  %s250_s1 = inlined_call_operand.vmem [shape: f32[1,32], index: 1, kind: input, shape index: {}]   ;;  %s251_s2 = inlined_call_operand.vmem [shape: f32[1,32], index: 2, kind: input, shape index: {}]   ;;  %s252_s3 = inlined_call_operand.hbm [shape: f32[16,32], index: 3, kind: output, shape index: {}]  }
   0x1   :  { %9 = vsyncpa [#allocation4], 0  ;;  %s183_s12 = smov [#allocation2]   ;;  %s135_s16 = scalar_lea.hbm %s249_s0, 256 }
   0x2   :  { %s15_s13 = sshll.u32 %s183_s12, 4  ;;  %p136_p0 = scmp.ne.s32.totalorder %s249_s0, %s135_s16  ;;  %s16_s13 = int_to_ptr.vmem [resolvable:$true] %s15_s13 }
   0x3   :  { %p139_p1 = scmp.lt.u32.totalorder %s135_s16, %s249_s0 }
   0x5   :  { %p141_p2 = pnand %p139_p1, %p136_p0 }
   0x7   :  { %144 = shalt.err (!%p141_p2)
}
   0x8   :  { %s145_s21 = scalar_lea.vmem %s16_s13, 256  ;;  %p150_p4 = scmp.lt.s32.totalorder %s16_s13, %s16_s13 }
   0x9   :  { %p146_p3 = scmp.ne.s32.totalorder %s16_s13, %s145_s21  ;;  %p151_p5 = scmp.lt.s32.totalorder %s145_s21, %s145_s21 }
   0xb   :  { %p152_p6 = por %p151_p5, %p150_p4 }
   0xd   :  { %p153_p7 = pnand %p152_p6, %p146_p3 }
   0xf   :  { %156 = shalt.err (!%p153_p7)
}
  0x10   :  { %s184_s22 = smov 128   ;;  %s185_s23 = smov 8  }
  0x11   :  { %21 = dma.hbm_to_vmem [thread:$0]  %s249_s0, 256, %s16_s13, [#allocation3], %s184_s22, %s184_s22, %s185_s23  }
  0x12   :  { %179 = dma.done.wait [#allocation3], 256  }
  0x13   :  { %180 = vsyncadd [#allocation3], 4294967040  ;;  %vm31_vm0 = vcmask 261120   ;;  %v29_v0 = vld [vmem:[#allocation2] sm:$0xff]  ;;  %v30_v1 = vld [vmem:[#allocation2 + $0x8] sm:$0xff]  ;;  %s186_s29 = smov [#allocation5]  }
  0x14   :  { %v32_v2 = vsel %vm31_vm0, %v29_v0, 0.0  ;;  %v38_v3 = vmul.f32 %v29_v0, %v29_v0  ;;  %v39_v4 = vmul.f32 %v30_v1, %v30_v1  ;;  %v35_v6 = vsel %vm31_vm0, %v30_v1, 0.0  ;;  %v121_v42 = vld [vmem:[%s250_s1] ss:$0 sm:$0xff]  ;;  %s109_s30 = sshll.u32 %s186_s29, 4  ;;  %s110_s30 = int_to_ptr.vmem [resolvable:$true] %s109_s30 }
  0x15   :  { %33 = vadd.xlane.f32.xlu1 %v32_v2  ;;  %v122_v44 = vld [vmem:[%s251_s2] ss:$0 sm:$0xff]  ;;  %s157_s1 = scalar_lea.vmem %s110_s30, 256  ;;  %p162_p9 = scmp.lt.s32.totalorder %s110_s30, %s110_s30 }
  0x16   :  { %v40_v5 = vsel %vm31_vm0, %v38_v3, 0.0  ;;  %v43_v7 = vsel %vm31_vm0, %v39_v4, 0.0  ;;  %p158_p8 = scmp.ne.s32.totalorder %s110_s30, %s157_s1  ;;  %p163_p10 = scmp.lt.s32.totalorder %s157_s1, %s157_s1 }
  0x17   :  { %41 = vadd.xlane.f32.xlu0 %v40_v5 }
  0x18   :  { %p164_p11 = por %p163_p10, %p162_p9 }
  0x19   :  { %36 = vadd.xlane.f32.xlu1 %v35_v6 }
  0x1a   :  { %p165_p12 = pnand %p164_p11, %p158_p8 }
  0x1b   :  { %44 = vadd.xlane.f32.xlu0 %v43_v7 }
  0xa2   :  { %v34_v11 = vpop.xlane.xlu1 %33 }
  0xa3   :  { %v46_v13 = vmul.f32 0.03125, %v34_v11 }
  0xa4   :  { %v42_v8 = vpop.xlane.xlu0 %41 }
  0xa5   :  { %v48_v9 = vmul.f32 0.03125, %v42_v8  ;;  %v64_v16 = vmul.f32 %v46_v13, %v46_v13  ;;  %v80_v40 = vsub.f32 %v29_v0, %v46_v13 }
  0xa6   :  { %v37_v14 = vpop.xlane.xlu1 %36 }
  0xa7   :  { %127 = vrsqrt.f32 %v48_v9  ;;  %v47_v18 = vmul.f32 0.03125, %v37_v14  ;;  %vm52_vm1 = vcmp.eq.f32.partialorder %v48_v9, inf  ;;  %v55_v19 = vand.u32 2147483648, %v48_v9 }
  0xa8   :  { %v45_v10 = vpop.xlane.xlu0 %44  ;;  %vm54_vm2 = vcmp.eq.f32.partialorder %v48_v9, 0.0  ;;  %v66_v23 = vsub.f32 %v48_v9, %v64_v16 }
  0xa9   :  { %v49_v12 = vmul.f32 0.03125, %v45_v10  ;;  %v65_v24 = vmul.f32 %v47_v18, %v47_v18  ;;  %v81_v45 = vsub.f32 %v30_v1, %v47_v18 }
  0xaa   :  { %v68_v33 = vmax.f32 %v66_v23, 0.0 }
  0xab   :  { %129 = vrsqrt.f32 %v49_v12  ;;  %vm59_vm3 = vcmp.eq.f32.partialorder %v49_v12, inf  ;;  %v62_v27 = vand.u32 2147483648, %v49_v12  ;;  %vm61_vm4 = vcmp.eq.f32.partialorder %v49_v12, 0.0 }
  0xac   :  { %v67_v31 = vsub.f32 %v49_v12, %v65_v24 }
  0xae   :  { %v69_v37 = vmax.f32 %v67_v31, 0.0 }
  0xb1   :  { %v128_v15 = vpop.eup %127 }
  0xb2   :  { %v51_v17 = vmul.f32 %v128_v15, %v48_v9 }
  0xb4   :  { %v53_v20 = vsel %vm52_vm1, %v48_v9, %v51_v17 }
  0xb5   :  { %v130_v21 = vpop.eup %129  ;;  %v56_v22 = vsel %vm54_vm2, %v55_v19, %v53_v20 }
  0xb6   :  { %v58_v25 = vmul.f32 %v130_v21, %v49_v12  ;;  %v70_v26 = vadd.f32 1e-05, %v56_v22 }
  0xb8   :  { %v60_v28 = vsel %vm59_vm3, %v49_v12, %v58_v25  ;;  %v72_v29 = vmul.f32 1e-05, %v70_v26 }
  0xb9   :  { %v63_v30 = vsel %vm61_vm4, %v62_v27, %v60_v28 }
  0xba   :  { %v71_v32 = vadd.f32 1e-05, %v63_v30  ;;  %v74_v34 = vmul.f32 %v72_v29, %v70_v26 }
  0xbc   :  { %v73_v35 = vmul.f32 1e-05, %v71_v32  ;;  %v76_v36 = vadd.f32 %v74_v34, %v68_v33 }
  0xbe   :  { %v75_v38 = vmul.f32 %v73_v35, %v71_v32  ;;  %131 = vrsqrt.f32 %v76_v36 }
  0xc0   :  { %v77_v39 = vadd.f32 %v75_v38, %v69_v37 }
  0xc2   :  { %133 = vrsqrt.f32 %v77_v39 }
  0xc8   :  { %v132_v41 = vpop.eup %131 }
  0xc9   :  { %v82_v43 = vmul.f32 %v132_v41, %v80_v40 }
  0xcb   :  { %v91_v46 = vmul.f32 %v121_v42, %v82_v43 }
  0xcc   :  { %v134_v47 = vpop.eup %133 }
  0xcd   :  { %v83_v48 = vmul.f32 %v134_v47, %v81_v45  ;;  %v100_v49 = vadd.f32 %v122_v44, %v91_v46 }
  0xcf   :  { %v92_v50 = vmul.f32 %v121_v42, %v83_v48  ;;  %102 = vst.msk [vmem:[#allocation5] sm:$0xff] %vm31_vm0, %v100_v49 }
  0xd1   :  { %v101_v51 = vadd.f32 %v122_v44, %v92_v50 }
  0xd3   :  { %103 = vst.msk [vmem:[#allocation5 + $0x8] sm:$0xff] %vm31_vm0, %v101_v51 }
  0xd4   :  { %168 = shalt.err (!%p165_p12)
}
  0xd5   :  { %s169_s5 = scalar_lea.hbm %s252_s3, 256 }
  0xd6   :  { %p170_p13 = scmp.ne.s32.totalorder %s252_s3, %s169_s5  ;;  %p173_p0 = scmp.lt.u32.totalorder %s169_s5, %s252_s3 }
  0xd8   :  { %p175_p1 = pnand %p173_p0, %p170_p13 }
  0xda   :  { %178 = shalt.err (!%p175_p1)
}
  0xdb   :  { %115 = dma.vmem_to_hbm [thread:$0]  %s110_s30, 256, %s252_s3, [#allocation4], %s184_s22, %s184_s22, %s185_s23  }
  0xdc   :  { %181 = dma.done.wait [#allocation4], 256  }
  0xdd   :  { %182 = vsyncadd [#allocation4], 4294967040 }
  0xde   :  { %119 = vsyncpa [#allocation3], 1 }
  0xdf   :  { %120 = vsyncpa [#allocation4], 1 }

</bundles_post_ra>
